<compile_context>
chip_gen: v7x
topology: tpu7x:2x2x1
jax: 0.10.0
libtpu: 0.0.40
codegen_flags: <defaults>
</compile_context>

<pallas_src>
import jax
import jax.numpy as jnp
from jax.experimental import pallas as pl
from jax.experimental.pallas import tpu as pltpu


def _patch_embed_kernel(p_ref, w_ref, b_ref, pos_ref, o_ref):
    # p_ref: (TM, Kpad)  w_ref: (Kpad, D)  b_ref: (1, D)  pos_ref/o_ref: (TM, D)
    proj = jnp.dot(p_ref[...], w_ref[...], preferred_element_type=jnp.float32)
    o_ref[...] = (proj + b_ref[...] + pos_ref[...]).astype(o_ref.dtype)


def _images_per_tile(B, N, target_rows=256):
    """Largest whole-image row tile that is sublane-aligned and <= target."""
    best = None
    for bpt in range(1, B + 1):
        if B % bpt:
            continue
        rows = bpt * N
        if rows % 8 == 0 and rows <= target_rows:
            best = bpt
    # Fallback: a single full-extent block is always a legal BlockSpec.
    return best if best is not None else B


def patch_embedding(x, conv_w, conv_b, cls_token, pos_embedding, patch_size):
    """x: (B, C, H, W) NCHW.  conv_w: (D, C, P, P).  Returns (B, N+1, D)."""
    B, C, H, W = x.shape
    D = conv_w.shape[0]
    P = patch_size
    nh, nw = H // P, W // P
    N = nh * nw
    K = C * P * P
    Kpad = ((K + 127) // 128) * 128
    M = B * N

    # Unfold the strided conv into flat patches; K is laid out (C, ph, pw) to
    # match PyTorch's Conv2d weight layout / contraction order.
    # TODO(synk): for large images, feed NHWC (or DMA row strips in-kernel via
    # memory_space=pl.ANY) to avoid this extra HBM relayout pass.
    patches = x.reshape(B, C, nh, P, nw, P)
    patches = patches.transpose(0, 2, 4, 1, 3, 5).reshape(M, K)
    patches = jnp.pad(patches, ((0, 0), (0, Kpad - K)))          # (M, Kpad)

    w_mat = jnp.pad(conv_w.reshape(D, K), ((0, 0), (0, Kpad - K))).T  # (Kpad, D)
    bias = conv_b.reshape(1, D)

    pos = pos_embedding.reshape(N + 1, D)
    bpt = _images_per_tile(B, N)          # images per row tile
    TM = bpt * N                          # rows per tile (covers whole images)
    pos_tile = jnp.tile(pos[1:], (bpt, 1))                        # (TM, D)

    grid = (M // TM,)
    flops = 2 * M * Kpad * D
    bytes_accessed = 4 * (M * Kpad + Kpad * D + M * D + TM * D + D)

    proj = pl.pallas_call(
        _patch_embed_kernel,
        out_shape=jax.ShapeDtypeStruct((M, D), x.dtype),
        grid_spec=pltpu.PrefetchScalarGridSpec(
            num_scalar_prefetch=0,
            grid=grid,
            in_specs=[
                pl.BlockSpec((TM, Kpad), lambda i: (i, 0)),   # patches (tiled rows)
                pl.BlockSpec((Kpad, D), lambda i: (0, 0)),    # weight (resident)
                pl.BlockSpec((1, D), lambda i: (0, 0)),       # bias   (resident)
                pl.BlockSpec((TM, D), lambda i: (0, 0)),      # pos    (resident)
            ],
            out_specs=pl.BlockSpec((TM, D), lambda i: (i, 0)),
        ),
        compiler_params=pltpu.CompilerParams(
            dimension_semantics=("parallel",),
        ),
        cost_estimate=pl.CostEstimate(
            flops=flops, transcendentals=0, bytes_accessed=bytes_accessed
        ),
    )(patches, w_mat, bias, pos_tile)

    proj = proj.reshape(B, N, D)
    # cls row handled in the wrapper: trivial (B, 1, D) broadcast + fused concat.
    cls_row = (cls_token.reshape(1, 1, D) + pos[:1].reshape(1, 1, D)).astype(x.dtype)
    cls_rows = jnp.broadcast_to(cls_row, (B, 1, D))
    return jnp.concatenate([cls_rows, proj], axis=1)


def _reference(x, conv_w, conv_b, cls_token, pos_embedding, patch_size):
    """Plain-JAX reference matching the PyTorch forward semantics."""
    B, C, H, W = x.shape
    D = conv_w.shape[0]
    P = patch_size
    nh, nw = H // P, W // P
    N = nh * nw
    patches = x.reshape(B, C, nh, P, nw, P).transpose(0, 2, 4, 1, 3, 5)
    patches = patches.reshape(B, N, C * P * P)
    proj = jnp.einsum("bnk,dk->bnd", patches, conv_w.reshape(D, -1)) + conv_b
    cls = jnp.broadcast_to(cls_token, (B, 1, D))
    return jnp.concatenate([cls, proj], axis=1) + pos_embedding


if __name__ == "__main__":
    # Small shapes consistent with the module's forward pass.
    B, C, IMG, P, D = 2, 3, 16, 4, 128
    N = (IMG // P) ** 2  # 16 patches

    key = jax.random.PRNGKey(0)
    kx, kw, kb, kc, kp = jax.random.split(key, 5)

    x = jax.random.normal(kx, (B, C, IMG, IMG), dtype=jnp.float32)
    conv_w = jax.random.normal(kw, (D, C, P, P), dtype=jnp.float32) * 0.02
    conv_b = jax.random.normal(kb, (D,), dtype=jnp.float32) * 0.02
    cls_token = jax.random.normal(kc, (1, 1, D), dtype=jnp.float32)
    pos_embedding = jax.random.normal(kp, (1, N + 1, D), dtype=jnp.float32)

    out = patch_embedding(x, conv_w, conv_b, cls_token, pos_embedding, P)
    out = jax.block_until_ready(out)

    ref = _reference(x, conv_w, conv_b, cls_token, pos_embedding, P)
    assert out.shape == (B, N + 1, D), out.shape
    assert jnp.allclose(out, ref, atol=1e-4, rtol=1e-4), "mismatch vs reference"

    print("KERNEL_OK")
</pallas_src>

<mosaic_0001>
module attributes {stable_mosaic.version = 11 : i64} {
  func.func @_patch_embed_kernel(%arg0: i32, %arg1: memref<32x128xf32, #tpu.memory_space<vmem>>, %arg2: memref<128x128xf32, #tpu.memory_space<vmem>>, %arg3: memref<1x128xf32, #tpu.memory_space<vmem>>, %arg4: memref<32x128xf32, #tpu.memory_space<vmem>>, %arg5: memref<32x128xf32, #tpu.memory_space<vmem>>) attributes {dimension_semantics = [#tpu.dimension_semantics<parallel>], iteration_bounds = array<i64: 1>, scalar_prefetch = 0 : i64, scratch_operands = 0 : i64, tpu.core_type = #tpu.core_type<tc>, window_params = [{transform_indices = @transform_0, window_bounds = array<i64: 32, 128>}, {pipeline_mode = #tpu.pipeline_mode<synchronous>, transform_indices = @transform_1, window_bounds = array<i64: 128, 128>}, {pipeline_mode = #tpu.pipeline_mode<synchronous>, transform_indices = @transform_2, window_bounds = array<i64: 1, 128>}, {pipeline_mode = #tpu.pipeline_mode<synchronous>, transform_indices = @transform_3, window_bounds = array<i64: 32, 128>}, {transform_indices = @transform_4, window_bounds = array<i64: 32, 128>}]} {
    %c0 = arith.constant 0 : index
    %c0_0 = arith.constant 0 : index
    %0 = vector.load %arg1[%c0, %c0_0] : memref<32x128xf32, #tpu.memory_space<vmem>>, vector<32x128xf32>
    %c0_1 = arith.constant 0 : index
    %c0_2 = arith.constant 0 : index
    %1 = vector.load %arg2[%c0_1, %c0_2] : memref<128x128xf32, #tpu.memory_space<vmem>>, vector<128x128xf32>
    %cst = arith.constant dense<0.000000e+00> : vector<32x128xf32>
    %2 = tpu.matmul %0, %1, %cst {dimension_numbers = #tpu.dot_dimension_numbers<[1], [0], [0], [1], [0, 0, 1, 1], [], []>} : vector<32x128xf32>, vector<128x128xf32>, vector<32x128xf32> -> vector<32x128xf32>
    %c0_3 = arith.constant 0 : index
    %c0_4 = arith.constant 0 : index
    %3 = vector.load %arg3[%c0_3, %c0_4] : memref<1x128xf32, #tpu.memory_space<vmem>>, vector<1x128xf32>
    %4 = vector.broadcast %3 : vector<1x128xf32> to vector<32x128xf32>
    %5 = arith.addf %2, %4 : vector<32x128xf32>
    %c0_5 = arith.constant 0 : index
    %c0_6 = arith.constant 0 : index
    %6 = vector.load %arg4[%c0_5, %c0_6] : memref<32x128xf32, #tpu.memory_space<vmem>>, vector<32x128xf32>
    %7 = arith.addf %5, %6 : vector<32x128xf32>
    %c0_7 = arith.constant 0 : index
    %c0_8 = arith.constant 0 : index
    %8 = vector.load %arg5[%c0_7, %c0_8] : memref<32x128xf32, #tpu.memory_space<vmem>>, vector<32x128xf32>
    tpu.vector_store %arg5[%c0_7, %c0_8], %7 {strides = array<i32>} : memref<32x128xf32, #tpu.memory_space<vmem>>, vector<32x128xf32>,
    return
  }
  func.func @transform_0(%arg0: i32) -> (i32, i32) {
    %c0_i32 = arith.constant 0 : i32
    %c0_i32_0 = arith.constant 0 : i32
    return %arg0, %c0_i32 : i32, i32
  }
  func.func @transform_1(%arg0: i32) -> (i32, i32) {
    %c0_i32 = arith.constant 0 : i32
    %c0_i32_0 = arith.constant 0 : i32
    %c0_i32_1 = arith.constant 0 : i32
    return %c0_i32, %c0_i32_0 : i32, i32
  }
  func.func @transform_2(%arg0: i32) -> (i32, i32) {
    %c0_i32 = arith.constant 0 : i32
    %c0_i32_0 = arith.constant 0 : i32
    %c0_i32_1 = arith.constant 0 : i32
    return %c0_i32, %c0_i32_0 : i32, i32
  }
  func.func @transform_3(%arg0: i32) -> (i32, i32) {
    %c0_i32 = arith.constant 0 : i32
    %c0_i32_0 = arith.constant 0 : i32
    %c0_i32_1 = arith.constant 0 : i32
    return %c0_i32, %c0_i32_0 : i32, i32
  }
  func.func @transform_4(%arg0: i32) -> (i32, i32) {
    %c0_i32 = arith.constant 0 : i32
    %c0_i32_0 = arith.constant 0 : i32
    return %arg0, %c0_i32 : i32, i32
  }
}

</mosaic_0001>

<bundles_post_ra>
// kernel: tpu_custom_call.1
= control target key start
LH: loop header
LB: loop body
LE: loop exit
PB: predicated region body
PF: predicated region fallthrough
CT: control target
= control target key end

     0   :  { %9 = vsyncpa [#allocation3], 0  ;;  %s509_s0 = inlined_call_operand.hbm [shape: f32[32,128], index: 0, kind: input, shape index: {}]   ;;  %s510_s1 = inlined_call_operand.hbm [shape: f32[128,128], index: 1, kind: input, shape index: {}]   ;;  %s511_s2 = inlined_call_operand.vmem [shape: f32[1,128], index: 2, kind: input, shape index: {}]   ;;  %s512_s3 = inlined_call_operand.hbm [shape: f32[32,128], index: 3, kind: input, shape index: {}]   ;;  %s513_s4 = inlined_call_operand.hbm [shape: f32[32,128], index: 4, kind: output, shape index: {}]  }
   0x1   :  { %10 = vsyncpa [#allocation6], 0 }
   0x2   :  { %11 = vsyncpa [#allocation4], 0  ;;  %s408_s15 = smov [#allocation5]   ;;  %s409_s17 = smov [#allocation2]  }
   0x3   :  { %s29_s16 = sshll.u32 %s408_s15, 4  ;;  %s17_s18 = sshll.u32 %s409_s17, 4  ;;  %s30_s16 = int_to_ptr.vmem [resolvable:$true] %s29_s16  ;;  %s439_s18 = int_to_ptr.vmem [resolvable:$true] %s17_s18 }
   0x4   :  { %s314_s21 = scalar_lea.hbm %s510_s1, 2048 }
   0x5   :  { %p315_p0 = scmp.ne.s32.totalorder %s510_s1, %s314_s21  ;;  %p318_p1 = scmp.lt.u32.totalorder %s314_s21, %s510_s1 }
   0x7   :  { %p320_p2 = pnand %p318_p1, %p315_p0 }
   0x9   :  { %323 = shalt.err (!%p320_p2)
}
   0xa   :  { %s324_s26 = scalar_lea.vmem %s30_s16, 2048  ;;  %p329_p4 = scmp.lt.s32.totalorder %s30_s16, %s30_s16 }
   0xb   :  { %p325_p3 = scmp.ne.s32.totalorder %s30_s16, %s324_s26  ;;  %p330_p5 = scmp.lt.s32.totalorder %s324_s26, %s324_s26 }
   0xd   :  { %p331_p6 = por %p330_p5, %p329_p4 }
   0xf   :  { %p332_p7 = pnand %p331_p6, %p325_p3 }
  0x11   :  { %335 = shalt.err (!%p332_p7)
}
  0x12   :  { %s410_s27 = smov 128   ;;  %s411_s28 = smov 8  }
  0x13   :  { %35 = dma.hbm_to_vmem [thread:$0]  %s510_s1, 2048, %s30_s16, [#allocation6], %s410_s27, %s410_s27, %s411_s28  }
  0x14   :  { %s336_s7 = scalar_lea.hbm %s509_s0, 512 }
  0x15   :  { %p337_p8 = scmp.ne.s32.totalorder %s509_s0, %s336_s7  ;;  %p340_p9 = scmp.lt.u32.totalorder %s336_s7, %s509_s0 }
  0x17   :  { %p342_p10 = pnand %p340_p9, %p337_p8 }
  0x19   :  { %345 = shalt.err (!%p342_p10)
}
  0x1a   :  { %s346_s12 = scalar_lea.vmem %s439_s18, 512  ;;  %p351_p12 = scmp.lt.s32.totalorder %s439_s18, %s439_s18 }
  0x1b   :  { %p347_p11 = scmp.ne.s32.totalorder %s439_s18, %s346_s12  ;;  %p352_p13 = scmp.lt.s32.totalorder %s346_s12, %s346_s12 }
  0x1d   :  { %p353_p0 = por %p352_p13, %p351_p12 }
  0x1f   :  { %p354_p1 = pnand %p353_p0, %p347_p11 }
  0x21   :  { %357 = shalt.err (!%p354_p1)
}
  0x22   :  { %23 = dma.hbm_to_vmem [thread:$0]  %s509_s0, 512, %s439_s18, [#allocation3], %s410_s27, %s410_s27, %s411_s28  }
  0x23   :  { %s412_s14 = smov [#allocation7]   ;;  %s358_s19 = scalar_lea.hbm %s512_s3, 512 }
  0x24   :  { %s43_s15 = sshll.u32 %s412_s14, 4  ;;  %p359_p2 = scmp.ne.s32.totalorder %s512_s3, %s358_s19  ;;  %s44_s15 = int_to_ptr.vmem [resolvable:$true] %s43_s15 }
  0x25   :  { %p362_p3 = scmp.lt.u32.totalorder %s358_s19, %s512_s3 }
  0x27   :  { %p364_p4 = pnand %p362_p3, %p359_p2 }
  0x29   :  { %367 = shalt.err (!%p364_p4)
}
  0x2a   :  { %s368_s24 = scalar_lea.vmem %s44_s15, 512  ;;  %p373_p6 = scmp.lt.s32.totalorder %s44_s15, %s44_s15 }
  0x2b   :  { %p369_p5 = scmp.ne.s32.totalorder %s44_s15, %s368_s24  ;;  %p374_p7 = scmp.lt.s32.totalorder %s368_s24, %s368_s24 }
  0x2d   :  { %p375_p8 = por %p374_p7, %p373_p6 }
  0x2f   :  { %p376_p9 = pnand %p375_p8, %p369_p5 }
  0x31   :  { %379 = shalt.err (!%p376_p9)
}
  0x32   :  { %49 = dma.hbm_to_vmem [thread:$0]  %s512_s3, 512, %s44_s15, [#allocation6], %s410_s27, %s410_s27, %s411_s28  }
  0x33   :  { %402 = dma.done.wait [#allocation3], 512  }
  0x34   :  { %403 = vsyncadd [#allocation3], 4294966784 }
  0x35   :  { %404 = dma.done.wait [#allocation6], 2560  }
  0x36   :  { %405 = vsyncadd [#allocation6], 4294964736  ;;  %v63_v0 = vld [vmem:[#allocation5] sm:$0xff]  ;;  %v64_v1 = vld [vmem:[#allocation5 + $0x8] sm:$0xff]  ;;  %s413_s26 = smov [#allocation8]  }
  0x37   :  { %v65_v2 = vld [vmem:[#allocation5 + $0x10] sm:$0xff]  ;;  %v260_v3 = vpack.c.bf16 %v64_v1, %v63_v0  ;;  %v66_v4 = vld [vmem:[#allocation5 + $0x18] sm:$0xff]  ;;  %v67_v6 = vld [vmem:[#allocation5 + $0x20] sm:$0xff]  ;;  %s188_s29 = sshll.u32 %s413_s26, 4  ;;  %s189_s29 = int_to_ptr.vmem [resolvable:$true] %s188_s29 }
  0x38   :  { %v264_v5 = vpack.c.bf16 %v66_v4, %v65_v2  ;;  %v68_v7 = vld [vmem:[#allocation5 + $0x28] sm:$0xff]  ;;  %v59_v9 = vld [vmem:[#allocation2] sm:$0xff]  ;;  %v61_v10 = vld [vmem:[#allocation2 + $0x10] sm:$0xff]  ;;  %p385_p11 = scmp.lt.s32.totalorder %s189_s29, %s189_s29 }
  0x39   :  { %261 = vmatprep.subr.bf16.mxu0 %v260_v3  ;;  %292 = vmatprep.subr.bf16.mxu1 %v260_v3  ;;  %v268_v8 = vpack.c.bf16 %v68_v7, %v67_v6  ;;  %v69_v11 = vld [vmem:[#allocation5 + $0x30] sm:$0xff]  ;;  %v70_v12 = vld [vmem:[#allocation5 + $0x38] sm:$0xff]  ;;  %v71_v14 = vld [vmem:[#allocation5 + $0x40] sm:$0xff] }
  0x3a   :  { %263 = vmatpush3.bf16.msra.mxu0 %v260_v3  ;;  %300 = vmatpush3.bf16.msra.mxu1 %v260_v3  ;;  %v272_v13 = vpack.c.bf16 %v70_v12, %v69_v11  ;;  %v72_v15 = vld [vmem:[#allocation5 + $0x48] sm:$0xff]  ;;  %v73_v17 = vld [vmem:[#allocation5 + $0x50] sm:$0xff]  ;;  %v74_v18 = vld [vmem:[#allocation5 + $0x58] sm:$0xff] }
  0x3b   :  { %265 = vmatprep.subr.bf16.mxu0 %v264_v5  ;;  %293 = vmatprep.subr.bf16.mxu1 %v264_v5  ;;  %v276_v16 = vpack.c.bf16 %v72_v15, %v71_v14  ;;  %v280_v19 = vpack.c.bf16 %v74_v18, %v73_v17  ;;  %v75_v20 = vld [vmem:[#allocation5 + $0x60] sm:$0xff]  ;;  %v76_v21 = vld [vmem:[#allocation5 + $0x68] sm:$0xff]  ;;  %v77_v23 = vld [vmem:[#allocation5 + $0x70] sm:$0xff] }
  0x3c   :  { %254 = vmatprep.mubr.f32.mxu0 %v59_v9  ;;  %257 = vmatprep.mubr.f32.mxu1 %v61_v10  ;;  %v284_v22 = vpack.c.bf16 %v76_v21, %v75_v20  ;;  %v78_v24 = vld [vmem:[#allocation5 + $0x78] sm:$0xff]  ;;  %v60_v26 = vld [vmem:[#allocation2 + $0x8] sm:$0xff]  ;;  %v201_v28 = vld [vmem:[%s511_s2] ss:$0 sm:$0xff]  ;;  %s380_s2 = scalar_lea.vmem %s189_s29, 512 }
  0x3d   :  { %v288_v25 = vpack.c.bf16 %v78_v24, %v77_v23  ;;  %v62_v27 = vld [vmem:[#allocation2 + $0x18] sm:$0xff]  ;;  %v172_v30 = vld [vmem:[#allocation7 + $0x8] sm:$0xff]  ;;  %v171_v36 = vld [vmem:[#allocation7] sm:$0xff]  ;;  %p381_p10 = scmp.ne.s32.totalorder %s189_s29, %s380_s2  ;;  %p386_p12 = scmp.lt.s32.totalorder %s380_s2, %s380_s2 }
  0x3e   :  { %267 = vmatpush3.bf16.msra.mxu0 %v264_v5  ;;  %301 = vmatpush3.bf16.msra.mxu1 %v264_v5  ;;  %v174_v32 = vld [vmem:[#allocation7 + $0x18] sm:$0xff]  ;;  %v173_v38 = vld [vmem:[#allocation7 + $0x10] sm:$0xff] }
  0x3f   :  { %269 = vmatprep.subr.bf16.mxu0 %v268_v8  ;;  %294 = vmatprep.subr.bf16.mxu1 %v268_v8  ;;  %p387_p13 = por %p386_p12, %p385_p11 }
  0x41   :  { %p388_p0 = pnand %p387_p13, %p381_p10 }
  0x42   :  { %271 = vmatpush3.bf16.msra.mxu0 %v268_v8  ;;  %302 = vmatpush3.bf16.msra.mxu1 %v268_v8 }
  0x43   :  { %273 = vmatprep.subr.bf16.mxu0 %v272_v13  ;;  %295 = vmatprep.subr.bf16.mxu1 %v272_v13 }
  0x46   :  { %275 = vmatpush3.bf16.msra.mxu0 %v272_v13  ;;  %303 = vmatpush3.bf16.msra.mxu1 %v272_v13 }
  0x47   :  { %277 = vmatprep.subr.bf16.mxu0 %v276_v16  ;;  %296 = vmatprep.subr.bf16.mxu1 %v276_v16 }
  0x4a   :  { %279 = vmatpush3.bf16.msra.mxu0 %v276_v16  ;;  %304 = vmatpush3.bf16.msra.mxu1 %v276_v16 }
  0x4b   :  { %281 = vmatprep.subr.bf16.mxu0 %v280_v19  ;;  %297 = vmatprep.subr.bf16.mxu1 %v280_v19 }
  0x4e   :  { %283 = vmatpush3.bf16.msra.mxu0 %v280_v19  ;;  %305 = vmatpush3.bf16.msra.mxu1 %v280_v19 }
  0x4f   :  { %285 = vmatprep.subr.bf16.mxu0 %v284_v22  ;;  %298 = vmatprep.subr.bf16.mxu1 %v284_v22 }
  0x52   :  { %287 = vmatpush3.bf16.msra.mxu0 %v284_v22  ;;  %306 = vmatpush3.bf16.msra.mxu1 %v284_v22 }
  0x53   :  { %289 = vmatprep.subr.bf16.mxu0 %v288_v25  ;;  %299 = vmatprep.subr.bf16.mxu1 %v288_v25 }
  0x56   :  { %291 = vmatpush3.bf16.msra.mxu0 %v288_v25  ;;  %307 = vmatpush3.bf16.msra.mxu1 %v288_v25 }
  0x59   :  { %255 = vmatmul.mubr.f32.vlgmr.msra.gmra.mrb[0].mxu0 %v60_v26  ;;  %258 = vmatmul.mubr.f32.vlgmr.msra.gmra.mrb[0].mxu1 %v62_v27 }
 0x12c   :  { %v256_v29 = vpop.f32.mrb[0].mxu0  ;;  %v259_v31 = vpop.f32.mrb[0].mxu1 }
 0x12d   :  { %v158_v33 = vadd.f32 %v256_v29, %v201_v28  ;;  %v168_v34 = vadd.f32 %v259_v31, %v201_v28  ;;  %v152_v35 = vpop.f32.mrb[1].mxu0  ;;  %v162_v37 = vpop.f32.mrb[1].mxu1 }
 0x12e   :  { %v153_v39 = vadd.f32 %v201_v28, %v152_v35  ;;  %v163_v40 = vadd.f32 %v201_v28, %v162_v37 }
 0x12f   :  { %v176_v41 = vadd.f32 %v172_v30, %v158_v33  ;;  %v178_v42 = vadd.f32 %v174_v32, %v168_v34 }
 0x130   :  { %v175_v43 = vadd.f32 %v171_v36, %v153_v39  ;;  %v177_v44 = vadd.f32 %v173_v38, %v163_v40 }
 0x131   :  { %180 = vst [vmem:[#allocation8 + $0x8] sm:$0xff] %v176_v41  ;;  %182 = vst [vmem:[#allocation8 + $0x18] sm:$0xff] %v178_v42 }
 0x132   :  { %179 = vst [vmem:[#allocation8] sm:$0xff] %v175_v43  ;;  %181 = vst [vmem:[#allocation8 + $0x10] sm:$0xff] %v177_v44 }
 0x133   :  { %391 = shalt.err (!%p388_p0)
}
 0x134   :  { %s392_s6 = scalar_lea.hbm %s513_s4, 512 }
 0x135   :  { %p393_p1 = scmp.ne.s32.totalorder %s513_s4, %s392_s6  ;;  %p396_p2 = scmp.lt.u32.totalorder %s392_s6, %s513_s4 }
 0x137   :  { %p398_p3 = pnand %p396_p2, %p393_p1 }
 0x139   :  { %401 = shalt.err (!%p398_p3)
}
 0x13a   :  { %194 = dma.vmem_to_hbm [thread:$0]  %s189_s29, 512, %s513_s4, [#allocation4], %s410_s27, %s410_s27, %s411_s28  }
 0x13b   :  { %406 = dma.done.wait [#allocation4], 512  }
 0x13c   :  { %407 = vsyncadd [#allocation4], 4294966784 }
 0x13d   :  { %198 = vsyncpa [#allocation3], 1 }
 0x13e   :  { %199 = vsyncpa [#allocation6], 1 }
 0x13f   :  { %200 = vsyncpa [#allocation4], 1 }

</bundles_post_ra>
